<compile_context>
chip_gen: v6e
topology: v6e:2x2x1
jax: 0.10.0
libtpu: 0.0.40
codegen_flags: <defaults>
</compile_context>

<pallas_src>
import functools

import jax
import jax.numpy as jnp
from jax.experimental import pallas as pl
from jax.experimental.pallas import tpu as pltpu


# --------------------------- Static feature config ---------------------------
# Synthetic SparseFeat / DenseFeat columns mirroring the module's feature columns.
SPARSE_FEATS = [  # (name, vocab_size, embedding_dim)
    ("cat_a", 10, 4),
    ("cat_b", 20, 4),
    ("cat_c", 30, 4),
]
DENSE_FEATS = [  # (name, dimension)
    ("num_a", 2),
]
DNN_HIDDEN_UNITS = [32]
INIT_STD = 1e-4


def build_feature_index():
    # Same convention as build_input_features: each SparseFeat takes 1 column,
    # each DenseFeat takes `dimension` columns.
    feature_index = {}
    start = 0
    for name, _, _ in SPARSE_FEATS:
        feature_index[name] = (start, start + 1)
        start += 1
    for name, dim in DENSE_FEATS:
        feature_index[name] = (start, start + dim)
        start += dim
    return feature_index, start


FEATURE_INDEX, TOTAL_WIDTH = build_feature_index()


def _round_up(x, m):
    return ((x + m - 1) // m) * m


# ------------------------------ Fused Pallas kernel --------------------------
def _fused_forward_kernel(*refs, n_sparse, vocabs, emb_dims, dense_dim, n_layers):
    # refs = (idx_ref, dense_ref, emb_0..emb_{n_sparse-1},
    #         w_0, b_0, ..., w_{L-1}, b_{L-1}, out_ref, act_ref)
    idx_ref = refs[0]                                   # (TB, n_sparse) int32
    dense_ref = refs[1]                                 # (TB, dense_dim) f32
    emb_refs = refs[2:2 + n_sparse]                     # (vocab_f, emb_dim_f)
    wb_refs = refs[2 + n_sparse:2 + n_sparse + 2 * n_layers]
    out_ref = refs[-2]                                  # (TB, H_last)
    act_ref = refs[-1]                                  # VMEM scratch (TB, D_in) f32

    tb = idx_ref.shape[0]

    # --- embedding "gather" as one-hot matmuls, written into the concat scratch ---
    off = 0
    for f in range(n_sparse):
        idx_col = idx_ref[:, f:f + 1]                                   # (TB, 1)
        iota = jax.lax.broadcasted_iota(jnp.int32, (tb, vocabs[f]), 1)  # (TB, V)
        onehot = (idx_col == iota).astype(jnp.float32)                  # (TB, V)
        emb = jnp.dot(onehot, emb_refs[f][...],
                      preferred_element_type=jnp.float32)               # (TB, E)
        act_ref[:, off:off + emb_dims[f]] = emb
        off += emb_dims[f]

    # --- dense values appended (combined_dnn_input concat order: sparse then dense) ---
    act_ref[:, off:off + dense_dim] = dense_ref[...].astype(jnp.float32)

    # --- DNN: Linear + bias + ReLU per layer, intermediates stay on-chip ---
    x = act_ref[...]                                                    # (TB, D_in)
    for l in range(n_layers):
        w_ref = wb_refs[2 * l]
        b_ref = wb_refs[2 * l + 1]
        x = jnp.dot(x, w_ref[...], preferred_element_type=jnp.float32) + b_ref[...]
        x = jnp.maximum(x, 0.0)   # deepctr DNN applies activation on every layer

    out_ref[...] = x.astype(out_ref.dtype)


def fused_converter_dnnfm(sparse_idx, dense_vals, emb_tables, dnn_params):
    """Whole forward (embeddings + concat + DNN) in one pallas_call."""
    B, n_sparse = sparse_idx.shape
    dense_dim = dense_vals.shape[1]
    vocabs = tuple(t.shape[0] for t in emb_tables)
    emb_dims = tuple(t.shape[1] for t in emb_tables)
    d_in = sum(emb_dims) + dense_dim
    n_layers = len(dnn_params)
    h_last = dnn_params[-1][0].shape[1]

    # Batch tiling: TB multiple of 8 (f32 sublane), capped at 128; pad B to TB.
    TB = min(128, _round_up(max(B, 1), 8))
    B_pad = _round_up(B, TB)
    if B_pad != B:
        pad = B_pad - B
        sparse_idx = jnp.pad(sparse_idx, ((0, pad), (0, 0)))   # index 0 is valid
        dense_vals = jnp.pad(dense_vals, ((0, pad), (0, 0)))
    grid = (B_pad // TB,)

    in_specs = [
        pl.BlockSpec((TB, n_sparse), lambda i: (i, 0)),
        pl.BlockSpec((TB, dense_dim), lambda i: (i, 0)),
    ]
    operands = [sparse_idx, dense_vals]
    for t in emb_tables:                      # tiny tables: fully resident in VMEM
        in_specs.append(pl.BlockSpec(t.shape, lambda i: (0, 0)))
        operands.append(t)
    for (w, b) in dnn_params:                 # weights/bias resident across batch tiles
        b2 = b.reshape(1, -1)
        in_specs.append(pl.BlockSpec(w.shape, lambda i: (0, 0)))
        operands.append(w)
        in_specs.append(pl.BlockSpec(b2.shape, lambda i: (0, 0)))
        operands.append(b2)

    kernel = functools.partial(
        _fused_forward_kernel,
        n_sparse=n_sparse, vocabs=vocabs, emb_dims=emb_dims,
        dense_dim=dense_dim, n_layers=n_layers)

    out = pl.pallas_call(
        kernel,
        out_shape=jax.ShapeDtypeStruct((B_pad, h_last), jnp.float32),
        grid=grid,
        in_specs=in_specs,
        out_specs=pl.BlockSpec((TB, h_last), lambda i: (i, 0)),
        scratch_shapes=[pltpu.VMEM((TB, d_in), jnp.float32)],
        compiler_params=pltpu.CompilerParams(
            dimension_semantics=("parallel",),          # shards batch across TCs (v7x)
            vmem_limit_bytes=32 * 1024 * 1024),         # safe on 64 MiB (v7x) & 128 MiB
    )(*operands)
    return out[:B]


# --------------------------- Params & jitted forward -------------------------
def init_params(key):
    params = {"embeddings": {}, "dnn": []}
    keys = jax.random.split(key, len(SPARSE_FEATS) + len(DNN_HIDDEN_UNITS))
    k = 0
    # Embedding tables: normal(0, init_std), like create_embedding_matrix.
    for name, vocab, emb_dim in SPARSE_FEATS:
        params["embeddings"][name] = (
            INIT_STD * jax.random.normal(keys[k], (vocab, emb_dim), jnp.float32))
        k += 1
    # DNN layers: weight normal(0, init_std), bias zeros (deepctr DNN init).
    in_dim = sum(e for _, _, e in SPARSE_FEATS) + sum(d for _, d in DENSE_FEATS)
    for h in DNN_HIDDEN_UNITS:
        w = INIT_STD * jax.random.normal(keys[k], (in_dim, h), jnp.float32)
        b = jnp.zeros((h,), jnp.float32)
        params["dnn"].append((w, b))
        in_dim = h
        k += 1
    return params


@jax.jit
def converter_dnnfm_forward(params, X):
    """Forward matching Converter_DNNFM.forward (use_fm=False, use_dnn=True)."""
    # Glue (column slicing only) — everything else happens inside the fused kernel.
    idx_cols = []
    for name, _, _ in SPARSE_FEATS:
        s, e = FEATURE_INDEX[name]
        idx_cols.append(X[:, s:e].astype(jnp.int32))          # X[:, s:e].long()
    sparse_idx = jnp.concatenate(idx_cols, axis=-1)           # (B, n_sparse) int32

    dense_cols = []
    for name, _ in DENSE_FEATS:
        s, e = FEATURE_INDEX[name]
        dense_cols.append(X[:, s:e])
    dense_vals = jnp.concatenate(dense_cols, axis=-1)         # (B, dense_dim)

    emb_tables = [params["embeddings"][name] for name, _, _ in SPARSE_FEATS]
    return fused_converter_dnnfm(sparse_idx, dense_vals, emb_tables, params["dnn"])


# --------------------------------- main --------------------------------------
if __name__ == "__main__":
    key = jax.random.PRNGKey(0)
    k_params, k_idx, k_dense = jax.random.split(key, 3)

    params = init_params(k_params)

    batch = 2
    # Sparse columns: integer-valued floats within each vocab; dense columns: random.
    sparse_cols = []
    idx_keys = jax.random.split(k_idx, len(SPARSE_FEATS))
    for (name, vocab, _), kk in zip(SPARSE_FEATS, idx_keys):
        sparse_cols.append(
            jax.random.randint(kk, (batch, 1), 0, vocab).astype(jnp.float32))
    dense_cols = [jax.random.normal(k_dense, (batch, d), jnp.float32)
                  for _, d in DENSE_FEATS]
    X = jnp.concatenate(sparse_cols + dense_cols, axis=-1)    # (2, 5)

    out = converter_dnnfm_forward(params, X)
    out = jax.block_until_ready(out)

    assert out.shape == (batch, DNN_HIDDEN_UNITS[-1])
    assert bool(jnp.all(out >= 0.0))  # ReLU output
    # TODO(synk): dnn_dropout / dnn_use_bn are off in this config (inference path);
    # not implemented in the kernel.
    print("KERNEL_OK")
</pallas_src>

<mosaic_0001>
module attributes {stable_mosaic.version = 11 : i64} {
  func.func @_fused_forward_kernel(%arg0: i32, %arg1: memref<8x3xi32, #tpu.memory_space<vmem>>, %arg2: memref<8x2xf32, #tpu.memory_space<vmem>>, %arg3: memref<10x4xf32, #tpu.memory_space<vmem>>, %arg4: memref<20x4xf32, #tpu.memory_space<vmem>>, %arg5: memref<30x4xf32, #tpu.memory_space<vmem>>, %arg6: memref<14x32xf32, #tpu.memory_space<vmem>>, %arg7: memref<1x32xf32, #tpu.memory_space<vmem>>, %arg8: memref<8x32xf32, #tpu.memory_space<vmem>>, %arg9: memref<8x14xf32, #tpu.memory_space<vmem>>) attributes {dimension_semantics = [#tpu.dimension_semantics<parallel>], iteration_bounds = array<i64: 1>, scalar_prefetch = 0 : i64, scratch_operands = 1 : i64, tpu.core_type = #tpu.core_type<tc>, window_params = [{transform_indices = @transform_0, window_bounds = array<i64: 8, 3>}, {transform_indices = @transform_1, window_bounds = array<i64: 8, 2>}, {pipeline_mode = #tpu.pipeline_mode<synchronous>, transform_indices = @transform_2, window_bounds = array<i64: 10, 4>}, {pipeline_mode = #tpu.pipeline_mode<synchronous>, transform_indices = @transform_3, window_bounds = array<i64: 20, 4>}, {pipeline_mode = #tpu.pipeline_mode<synchronous>, transform_indices = @transform_4, window_bounds = array<i64: 30, 4>}, {pipeline_mode = #tpu.pipeline_mode<synchronous>, transform_indices = @transform_5, window_bounds = array<i64: 14, 32>}, {pipeline_mode = #tpu.pipeline_mode<synchronous>, transform_indices = @transform_6, window_bounds = array<i64: 1, 32>}, {transform_indices = @transform_7, window_bounds = array<i64: 8, 32>}]} {
    %c0 = arith.constant 0 : index
    %c0_0 = arith.constant 0 : index
    %0 = vector.load %arg1[%c0, %c0_0] : memref<8x3xi32, #tpu.memory_space<vmem>>, vector<8x1xi32>
    %1 = tpu.iota {dimensions = array<i32: 1>} : vector<8x10xi32>
    %2 = vector.broadcast %0 : vector<8x1xi32> to vector<8x10xi32>
    %3 = arith.cmpi eq, %2, %1 : vector<8x10xi32>
    %4 = arith.extui %3 : vector<8x10xi1> to vector<8x10xi32>
    %5 = arith.sitofp %4 : vector<8x10xi32> to vector<8x10xf32>
    %c0_1 = arith.constant 0 : index
    %c0_2 = arith.constant 0 : index
    %6 = vector.load %arg3[%c0_1, %c0_2] : memref<10x4xf32, #tpu.memory_space<vmem>>, vector<10x4xf32>
    %cst = arith.constant dense<0.000000e+00> : vector<8x4xf32>
    %7 = tpu.matmul %5, %6, %cst {dimension_numbers = #tpu.dot_dimension_numbers<[1], [0], [0], [1], [0, 0, 1, 1], [], []>} : vector<8x10xf32>, vector<10x4xf32>, vector<8x4xf32> -> vector<8x4xf32>
    %c0_3 = arith.constant 0 : index
    %c0_4 = arith.constant 0 : index
    %8 = vector.load %arg9[%c0_3, %c0_4] : memref<8x14xf32, #tpu.memory_space<vmem>>, vector<8x4xf32>
    tpu.vector_store %arg9[%c0_3, %c0_4], %7 {strides = array<i32>} : memref<8x14xf32, #tpu.memory_space<vmem>>, vector<8x4xf32>,
    %c0_5 = arith.constant 0 : index
    %c1 = arith.constant 1 : index
    %9 = vector.load %arg1[%c0_5, %c1] : memref<8x3xi32, #tpu.memory_space<vmem>>, vector<8x1xi32>
    %10 = tpu.iota {dimensions = array<i32: 1>} : vector<8x20xi32>
    %11 = vector.broadcast %9 : vector<8x1xi32> to vector<8x20xi32>
    %12 = arith.cmpi eq, %11, %10 : vector<8x20xi32>
    %13 = arith.extui %12 : vector<8x20xi1> to vector<8x20xi32>
    %14 = arith.sitofp %13 : vector<8x20xi32> to vector<8x20xf32>
    %c0_6 = arith.constant 0 : index
    %c0_7 = arith.constant 0 : index
    %15 = vector.load %arg4[%c0_6, %c0_7] : memref<20x4xf32, #tpu.memory_space<vmem>>, vector<20x4xf32>
    %cst_8 = arith.constant dense<0.000000e+00> : vector<8x4xf32>
    %16 = tpu.matmul %14, %15, %cst_8 {dimension_numbers = #tpu.dot_dimension_numbers<[1], [0], [0], [1], [0, 0, 1, 1], [], []>} : vector<8x20xf32>, vector<20x4xf32>, vector<8x4xf32> -> vector<8x4xf32>
    %c0_9 = arith.constant 0 : index
    %c4 = arith.constant 4 : index
    %17 = vector.load %arg9[%c0_9, %c4] : memref<8x14xf32, #tpu.memory_space<vmem>>, vector<8x4xf32>
    tpu.vector_store %arg9[%c0_9, %c4], %16 {strides = array<i32>} : memref<8x14xf32, #tpu.memory_space<vmem>>, vector<8x4xf32>,
    %c0_10 = arith.constant 0 : index
    %c2 = arith.constant 2 : index
    %18 = vector.load %arg1[%c0_10, %c2] : memref<8x3xi32, #tpu.memory_space<vmem>>, vector<8x1xi32>
    %19 = tpu.iota {dimensions = array<i32: 1>} : vector<8x30xi32>
    %20 = vector.broadcast %18 : vector<8x1xi32> to vector<8x30xi32>
    %21 = arith.cmpi eq, %20, %19 : vector<8x30xi32>
    %22 = arith.extui %21 : vector<8x30xi1> to vector<8x30xi32>
    %23 = arith.sitofp %22 : vector<8x30xi32> to vector<8x30xf32>
    %c0_11 = arith.constant 0 : index
    %c0_12 = arith.constant 0 : index
    %24 = vector.load %arg5[%c0_11, %c0_12] : memref<30x4xf32, #tpu.memory_space<vmem>>, vector<30x4xf32>
    %cst_13 = arith.constant dense<0.000000e+00> : vector<8x4xf32>
    %25 = tpu.matmul %23, %24, %cst_13 {dimension_numbers = #tpu.dot_dimension_numbers<[1], [0], [0], [1], [0, 0, 1, 1], [], []>} : vector<8x30xf32>, vector<30x4xf32>, vector<8x4xf32> -> vector<8x4xf32>
    %c0_14 = arith.constant 0 : index
    %c8 = arith.constant 8 : index
    %26 = vector.load %arg9[%c0_14, %c8] : memref<8x14xf32, #tpu.memory_space<vmem>>, vector<8x4xf32>
    tpu.vector_store %arg9[%c0_14, %c8], %25 {strides = array<i32>} : memref<8x14xf32, #tpu.memory_space<vmem>>, vector<8x4xf32>,
    %c0_15 = arith.constant 0 : index
    %c0_16 = arith.constant 0 : index
    %27 = vector.load %arg2[%c0_15, %c0_16] : memref<8x2xf32, #tpu.memory_space<vmem>>, vector<8x2xf32>
    %c0_17 = arith.constant 0 : index
    %c12 = arith.constant 12 : index
    %28 = vector.load %arg9[%c0_17, %c12] : memref<8x14xf32, #tpu.memory_space<vmem>>, vector<8x2xf32>
    tpu.vector_store %arg9[%c0_17, %c12], %27 {strides = array<i32>} : memref<8x14xf32, #tpu.memory_space<vmem>>, vector<8x2xf32>,
    %c0_18 = arith.constant 0 : index
    %c0_19 = arith.constant 0 : index
    %29 = vector.load %arg9[%c0_18, %c0_19] : memref<8x14xf32, #tpu.memory_space<vmem>>, vector<8x14xf32>
    %c0_20 = arith.constant 0 : index
    %c0_21 = arith.constant 0 : index
    %30 = vector.load %arg6[%c0_20, %c0_21] : memref<14x32xf32, #tpu.memory_space<vmem>>, vector<14x32xf32>
    %cst_22 = arith.constant dense<0.000000e+00> : vector<8x32xf32>
    %31 = tpu.matmul %29, %30, %cst_22 {dimension_numbers = #tpu.dot_dimension_numbers<[1], [0], [0], [1], [0, 0, 1, 1], [], []>} : vector<8x14xf32>, vector<14x32xf32>, vector<8x32xf32> -> vector<8x32xf32>
    %c0_23 = arith.constant 0 : index
    %c0_24 = arith.constant 0 : index
    %32 = vector.load %arg7[%c0_23, %c0_24] : memref<1x32xf32, #tpu.memory_space<vmem>>, vector<1x32xf32>
    %33 = vector.broadcast %32 : vector<1x32xf32> to vector<8x32xf32>
    %34 = arith.addf %31, %33 : vector<8x32xf32>
    %cst_25 = arith.constant 0.000000e+00 : f32
    %35 = vector.broadcast %cst_25 : f32 to vector<8x32xf32>
    %36 = arith.maximumf %34, %35 : vector<8x32xf32>
    %c0_26 = arith.constant 0 : index
    %c0_27 = arith.constant 0 : index
    %37 = vector.load %arg8[%c0_26, %c0_27] : memref<8x32xf32, #tpu.memory_space<vmem>>, vector<8x32xf32>
    tpu.vector_store %arg8[%c0_26, %c0_27], %36 {strides = array<i32>} : memref<8x32xf32, #tpu.memory_space<vmem>>, vector<8x32xf32>,
    return
  }
  func.func @transform_0(%arg0: i32) -> (i32, i32) {
    %c0_i32 = arith.constant 0 : i32
    %c0_i32_0 = arith.constant 0 : i32
    return %arg0, %c0_i32 : i32, i32
  }
  func.func @transform_1(%arg0: i32) -> (i32, i32) {
    %c0_i32 = arith.constant 0 : i32
    %c0_i32_0 = arith.constant 0 : i32
    return %arg0, %c0_i32 : i32, i32
  }
  func.func @transform_2(%arg0: i32) -> (i32, i32) {
    %c0_i32 = arith.constant 0 : i32
    %c0_i32_0 = arith.constant 0 : i32
    %c0_i32_1 = arith.constant 0 : i32
    return %c0_i32, %c0_i32_0 : i32, i32
  }
  func.func @transform_3(%arg0: i32) -> (i32, i32) {
    %c0_i32 = arith.constant 0 : i32
    %c0_i32_0 = arith.constant 0 : i32
    %c0_i32_1 = arith.constant 0 : i32
    return %c0_i32, %c0_i32_0 : i32, i32
  }
  func.func @transform_4(%arg0: i32) -> (i32, i32) {
    %c0_i32 = arith.constant 0 : i32
    %c0_i32_0 = arith.constant 0 : i32
    %c0_i32_1 = arith.constant 0 : i32
    return %c0_i32, %c0_i32_0 : i32, i32
  }
  func.func @transform_5(%arg0: i32) -> (i32, i32) {
    %c0_i32 = arith.constant 0 : i32
    %c0_i32_0 = arith.constant 0 : i32
    %c0_i32_1 = arith.constant 0 : i32
    return %c0_i32, %c0_i32_0 : i32, i32
  }
  func.func @transform_6(%arg0: i32) -> (i32, i32) {
    %c0_i32 = arith.constant 0 : i32
    %c0_i32_0 = arith.constant 0 : i32
    %c0_i32_1 = arith.constant 0 : i32
    return %c0_i32, %c0_i32_0 : i32, i32
  }
  func.func @transform_7(%arg0: i32) -> (i32, i32) {
    %c0_i32 = arith.constant 0 : i32
    %c0_i32_0 = arith.constant 0 : i32
    return %arg0, %c0_i32 : i32, i32
  }
}

</mosaic_0001>

<bundles_post_ra>
// kernel: converter_dnnfm_forward.1
= control target key start
LH: loop header
LB: loop body
LE: loop exit
PB: predicated region body
PF: predicated region fallthrough
CT: control target
= control target key end

     0   :  { %v480_v0 = vmov 0   ;;  %v481_v2 = vmov 2   ;;  %vm41_vm0 = vcmask 1041408   ;;  %vm131_vm1 = vcmask 1043456   ;;  %s485_s20 = smov 12   ;;  %s487_s24 = smov 8   ;;  %s597_s0 = inlined_call_operand.vmem [shape: s32[8,3], index: 0, kind: input, shape index: {}]   ;;  %s598_s2 = inlined_call_operand.vmem [shape: f32[10,4], index: 2, kind: input, shape index: {}]   ;;  %s599_s3 = inlined_call_operand.vmem [shape: f32[20,4], index: 3, kind: input, shape index: {}]   ;;  %s600_s4 = inlined_call_operand.vmem [shape: f32[30,4], index: 4, kind: input, shape index: {}]   ;;  %s601_s1 = inlined_call_operand.vmem [shape: f32[8,2], index: 1, kind: input, shape index: {}]   ;;  %s602_s5 = inlined_call_operand.vmem [shape: f32[14,32], index: 5, kind: input, shape index: {}]   ;;  %s603_s6 = inlined_call_operand.vmem [shape: f32[1,32], index: 6, kind: input, shape index: {}]   ;;  %s604_s7 = inlined_call_operand.vmem [shape: f32[8,32], index: 7, kind: output, shape index: {}]  }
   0x1   :  { %476 = vset.pattern.permute.xlu0 %v480_v0  ;;  %v26_v1 = vld [vmem:[%s597_s0] sm:$0xff]  ;;  %478 = vset.pattern.permute.xlu1 %v481_v2  ;;  %v36_v3 = vld [vmem:[%s598_s2 + $0x8] sm:$0x3]  ;;  %v126_v4 = vld [vmem:[%s599_s3 + $0x10] sm:$0xf]  ;;  %v482_v5 = vmov 0.0   ;;  %v27_v10 = vlaneseq }
   0x2   :  { %30 = vperm.xlu0 %476, %v26_v1   ;;  %213 = vperm.xlu1 %478, %v26_v1   ;;  %v35_v6 = vld [vmem:[%s598_s2] sm:$0xff]  ;;  %vm483_vm2 = vmmov 0   ;;  %v484_v7 = vmov 1   ;;  %v125_v8 = vld [vmem:[%s599_s3 + $0x8] sm:$0xff]  ;;  %vm37_vm3 = vcmask 80896   ;;  %vm226_vm5 = vcmask 1045504  }
   0x3   :  { %434 = vmatprep.subr.mxu0 %v482_v5  ;;  %438 = vmatprep.mubr.msk.f32.mxu0 %vm483_vm2, %v482_v5  ;;  %v124_v9 = vld [vmem:[%s599_s3] sm:$0xff]  ;;  %v28_v11 = vand.u32 127, %v27_v10  ;;  %v221_v13 = vld [vmem:[%s600_s4 + $0x18] sm:$0x3f]  ;;  %v220_v16 = vld [vmem:[%s600_s4 + $0x10] sm:$0xff]  ;;  %vm127_vm7 = vcmask 162816  }
   0x4   :  { %435 = vmatpush3.msk.msra.mxu0 %vm41_vm0, %v36_v3  ;;  %441 = vmatprep.subr.mxu1 %v482_v5  ;;  %v219_v18 = vld [vmem:[%s600_s4 + $0x8] sm:$0xff]  ;;  %v218_v20 = vld [vmem:[%s600_s4] sm:$0xff]  ;;  %vm222_vm9 = vcmask 244736   ;;  %vm115_vm10 = vcmask 31744   ;;  %vm209_vm11 = vcmask 64544   ;;  %vm304_vm12 = vcmask 97344  }
   0x5   :  { %436 = vmatprep.subr.mxu0 %v482_v5  ;;  %442 = vmatpush3.msk.msra.mxu1 %vm131_vm1, %v126_v4  ;;  %v306_v22 = vld [vmem:[%s601_s1] sm:$0xff]  ;;  %v315_v23 = vld [vmem:[%s602_s5 + $0x8] sm:$0x3f]  ;;  %s486_s1 = smov 4   ;;  %vm311_vm13 = vcmask 113760   ;;  %vm323_vm14 = vcmask 113664  }
   0x6   :  { %477 = vset.pattern.permute.xlu0 %v484_v7  ;;  %437 = vmatpush3.msra.mxu0 %v35_v6  ;;  %v314_v24 = vld [vmem:[%s602_s5] sm:$0xff]  ;;  %vm401_vm15 = vcmask 261120  }
   0x7   :  { %119 = vperm.xlu0 %477, %v26_v1   ;;  %450 = vmatprep.subr.mxu0 %v482_v5  ;;  %v416_v35 = vld [vmem:[%s603_s6] ss:$0 sm:$0xff] }
   0x8   :  { %443 = vmatprep.subr.mxu1 %v482_v5  ;;  %447 = vmatprep.mubr.msk.f32.mxu1 %vm483_vm2, %v482_v5 }
   0x9   :  { %444 = vmatpush3.msra.mxu1 %v125_v8 }
   0xa   :  { %445 = vmatprep.subr.mxu1 %v482_v5 }
   0xb   :  { %446 = vmatpush3.msra.mxu1 %v124_v9  ;;  %479 = vset.pattern.permute.xlu0 %v481_v2 }
   0xc   :  { %461 = vmatprep.subr.mxu1 %v482_v5  ;;  %308 = vrot.lane.b32.xlu0 %v306_v22, %s485_s20 }
  0x7d   :  { %v31_v12 = vpop.permute.xlu0 %30  ;;  %v214_v15 = vpop.permute.xlu1 %213 }
  0x7e   :  { %vm32_vm4 = vcmp.eq.s32.totalorder %v31_v12, %v28_v11  ;;  %vm215_vm6 = vcmp.eq.s32.totalorder %v214_v15, %v28_v11 }
  0x7f   :  { %v407_v14 = vsel %vm32_vm4, 1.0, %v482_v5  ;;  %v413_v21 = vsel %vm215_vm6, 1.0, %v482_v5 }
  0x80   :  { %439 = vmatmul.mubr.msk.f32.vlgmr.msra.gmra.mxu0 %vm37_vm3, %v407_v14 }
  0x81   :  { %451 = vmatpush3.msk.msra.mxu0 %vm226_vm5, %v221_v13  ;;  %458 = vmatprep.mubr.msk.f32.mxu0 %vm483_vm2, %v482_v5 }
  0x82   :  { %452 = vmatprep.subr.mxu0 %v482_v5  ;;  %v120_v17 = vpop.permute.xlu0 %119 }
  0x83   :  { %453 = vmatpush3.msra.mxu0 %v220_v16  ;;  %vm121_vm8 = vcmp.eq.s32.totalorder %v120_v17, %v28_v11 }
  0x84   :  { %v410_v19 = vsel %vm121_vm8, 1.0, %v482_v5  ;;  %454 = vmatprep.subr.mxu0 %v482_v5 }
  0x85   :  { %455 = vmatpush3.msra.mxu0 %v219_v18  ;;  %448 = vmatmul.mubr.msk.f32.vlgmr.msra.gmra.mxu1 %vm127_vm7, %v410_v19 }
  0x86   :  { %456 = vmatprep.subr.mxu0 %v482_v5  ;;  %465 = vmatprep.mubr.msk.f32.mxu1 %vm483_vm2, %v482_v5  ;;  %v309_v32 = vpop.permute.xlu0 %308 }
  0x87   :  { %457 = vmatpush3.msra.mxu0 %v218_v20  ;;  %462 = vmatpush3.msk.msra.mxu1 %vm226_vm5, %v315_v23 }
  0x88   :  { %459 = vmatmul.mubr.msk.f32.vlgmr.msra.gmra.mxu0 %vm222_vm9, %v413_v21  ;;  %463 = vmatprep.subr.mxu1 %v482_v5 }
  0x89   :  { %464 = vmatpush3.msra.mxu1 %v314_v24 }
 0x140   :  { %v111_v25 = vpop.f32.mrf.mxu0 }
 0x141   :  { %116 = vst.msk [vmem:[#allocation2] sm:$0xff] %vm115_vm10, %v111_v25 }
 0x142   :  { %v440_v26 = vpop.f32.mrf.mxu0 }
 0x145   :  { %v201_v27 = vpop.f32.mrf.mxu1 }
 0x146   :  { %206 = vrot.lane.b32.xlu1 %v201_v27, %s486_s1 }
 0x147   :  { %v449_v28 = vpop.f32.mrf.mxu1 }
 0x148   :  { %v296_v29 = vpop.f32.mrf.mxu0 }
 0x14a   :  { %v460_v30 = vpop.f32.mrf.mxu0  ;;  %301 = vrot.lane.b32.xlu1 %v296_v29, %s487_s24 }
 0x1b8   :  { %v207_v31 = vpop.permute.xlu1 %206 }
 0x1b9   :  { %210 = vst.msk [vmem:[#allocation2] sm:$0xff] %vm209_vm11, %v207_v31 }
 0x1bc   :  { %v302_v33 = vpop.permute.xlu1 %301 }
 0x1bd   :  { %305 = vst.msk [vmem:[#allocation2] sm:$0xff] %vm304_vm12, %v302_v33 }
 0x1be   :  { %312 = vst.msk [vmem:[#allocation2] sm:$0xff] %vm311_vm13, %v309_v32 }
 0x1c5   :  { %v313_v34 = vld [vmem:[#allocation2] sm:$0xff] }
 0x1c6   :  { %466 = vmatmul.mubr.msk.f32.vlgmr.msra.gmra.mxu1 %vm323_vm14, %v313_v34 }
 0x286   :  { %v396_v36 = vpop.f32.mrf.mxu1 }
 0x287   :  { %v397_v37 = vadd.f32 %v416_v35, %v396_v36 }
 0x288   :  { %v467_v38 = vpop.f32.mrf.mxu1 }
 0x289   :  { %v400_v39 = vmax.f32 %v397_v37, 0.0 }
 0x28b   :  { %402 = vst.msk [vmem:[%s604_s7] sm:$0xff] %vm401_vm15, %v400_v39 }

</bundles_post_ra>
